<compile_context>
chip_gen: v7x
topology: tpu7x:2x2x1
jax: 0.10.0
libtpu: 0.0.40
codegen_flags: <defaults>
</compile_context>

<pallas_src>
import functools

import jax
import jax.numpy as jnp
from jax.experimental import pallas as pl
from jax.experimental.pallas import tpu as pltpu

EPS = 1e-5
NEG_SLOPE = 0.2
LANES = 128
SUBLANES = 8
_VMEM_BUDGET = 24 * 1024 * 1024  # stay under the 32 MiB scoped default on every generation


def _round_up(x, m):
    return ((x + m - 1) // m) * m


# ---------------------------------------------------------------------------
# Phase 1: conv matmul (pre-bias) + per-channel sum / sum-of-squares partials.
# Grid (NC, n_half): outer axis = per-TensorCore partial (parallel), inner axis =
# sequential reduction into a grid-resident per-core stats block (arbitrary).
# ---------------------------------------------------------------------------
def _conv_stats_kernel(pat_ref, w_ref, *out_refs, store_z):
    # pat_ref: [TM, K] bf16   w_ref: [K, Cpad] bf16
    # out_refs: optional z tile [TM, Cpad] bf16, then stats accumulator [2, Cpad] f32.
    j = pl.program_id(1)

    z = jnp.dot(pat_ref[...], w_ref[...], preferred_element_type=jnp.float32)

    if store_z:
        z_ref, stats_ref = out_refs
        z_ref[...] = z.astype(z_ref.dtype)        # bf16 spill; stats stay f32-derived
    else:
        (stats_ref,) = out_refs

    @pl.when(j == 0)
    def _():
        stats_ref[...] = jnp.zeros_like(stats_ref)

    # Padded tail rows of pat are all-zero -> z == 0 there: no masking needed.
    # Rows written separately (no concatenate relayout).
    stats_ref[0:1, :] += jnp.sum(z, axis=0, keepdims=True)
    stats_ref[1:2, :] += jnp.sum(z * z, axis=0, keepdims=True)


# ---------------------------------------------------------------------------
# Phase 2: out = LeakyReLU(z * scale + shift), stored channel-major.
# ---------------------------------------------------------------------------
def _affine_lrelu_store(z, scale_ref, shift_ref, o_ref, c_rows):
    yh = z * scale_ref[...] + shift_ref[...]               # broadcast (1, Cpad)
    yh = jnp.where(yh >= 0, yh, NEG_SLOPE * yh)
    # Channel-major store: in-kernel XLU transpose (free, kernel is HBM-bound), then only
    # the first c_rows (= round_up(Cout, 8)) channel rows are written back.
    o_ref[...] = jnp.transpose(yh)[:c_rows, :].astype(o_ref.dtype)


def _recompute_norm_kernel(pat_ref, w_ref, scale_ref, shift_ref, o_ref, *, c_rows):
    # Small-K path: recompute the conv instead of round-tripping z through HBM.
    z = jnp.dot(pat_ref[...], w_ref[...], preferred_element_type=jnp.float32)
    _affine_lrelu_store(z, scale_ref, shift_ref, o_ref, c_rows)


def _stored_norm_kernel(z_ref, scale_ref, shift_ref, o_ref, *, c_rows):
    # Large-K path: read the bf16 z spill; upcast in-kernel (v5e has no bf16 VALU).
    _affine_lrelu_store(z_ref[...].astype(jnp.float32), scale_ref, shift_ref, o_ref, c_rows)


def batchnorm_block_forward(x, weight, bias, gamma, beta, *, tm=1024):
    """x: [N, Cin, H, W] NCHW. weight: [Cout, Cin, 3, 3]. Returns [N, Cout, Ho, Wo]."""
    del bias  # cancels exactly under training-mode BatchNorm; kept for interface parity.
    N, Cin, H, W = x.shape
    Cout = weight.shape[0]
    # Implicit module contract: equal channels -> stride 1, otherwise downsample by 2.
    stride = 1 if Cin == Cout else 2
    Ho = (H + 2 - 3) // stride + 1
    Wo = (W + 2 - 3) // stride + 1
    out_dtype = x.dtype

    M = N * Ho * Wo
    K = Cin * 9
    Cpad = _round_up(Cout, LANES)     # full 128-lane MXU RHS / lane-dense compute
    Cr = _round_up(Cout, SUBLANES)    # rows actually written by phase 2

    # ---- glue: NHWC taps -> [M, K] bf16 patch matrix (layout plumbing, plain JAX) ----
    # TODO(synk): fuse the 9-tap gather into the kernel (halo'd row-band DMA over NHWC x).
    x_nhwc = jnp.transpose(x, (0, 2, 3, 1))                       # single relayout of input
    xp = jnp.pad(x_nhwc, ((0, 0), (1, 1), (1, 1), (0, 0)))
    taps = [xp[:, kh:kh + stride * Ho:stride, kw:kw + stride * Wo:stride, :]
            for kh in range(3) for kw in range(3)]                # 9 x [N, Ho, Wo, Cin]
    pat = jnp.concatenate(taps, axis=-1).reshape(M, K).astype(jnp.bfloat16)

    # Weight as [K, Cpad] with K ordered (kh, kw, cin) to match the tap concatenation.
    w2d = jnp.zeros((K, Cpad), jnp.bfloat16).at[:, :Cout].set(
        weight.transpose(2, 3, 1, 0).reshape(K, Cout).astype(jnp.bfloat16))
    g_pad = jnp.zeros((Cpad,), jnp.float32).at[:Cout].set(gamma.astype(jnp.float32))
    be_pad = jnp.zeros((Cpad,), jnp.float32).at[:Cout].set(beta.astype(jnp.float32))

    # ---- M tiling: multiples of 128 rows, clamped so the working set fits VMEM ----
    store_z = K > 2 * Cpad   # large K: cheaper to spill z (bf16) than to redo the matmul
    TM = min(_round_up(max(tm, LANES), LANES), _round_up(M, LANES))

    def _vmem_bytes(t):  # double-buffered inputs + in-flight f32 tile (+ optional z spill)
        b = 2 * (t * K * 2) + 2 * (K * Cpad * 2) + 2 * (t * Cpad * 4)
        if store_z:
            b += 2 * (t * Cpad * 2)
        return b

    while TM > LANES and _vmem_bytes(TM) > _VMEM_BUDGET:
        TM = max(LANES, ((TM // 2) // LANES) * LANES)

    n_raw = -(-M // TM)
    NC = 2 if n_raw >= 2 else 1            # split the phase-1 reduction across v7x's 2 TCs
    n_tiles = _round_up(n_raw, NC)
    n_half = n_tiles // NC
    M_pad = n_tiles * TM
    if M_pad != M:
        pat = jnp.pad(pat, ((0, M_pad - M), (0, 0)))  # zero rows -> zero stats contribution

    # ---- phase 1: conv matmul + per-core (sum, sumsq) partials (optionally spill z) ----
    p1_out_shape = (jax.ShapeDtypeStruct((NC, 2, Cpad), jnp.float32),)
    p1_out_specs = (pl.BlockSpec((None, 2, Cpad), lambda c, j: (c, 0, 0)),)
    if store_z:
        p1_out_shape = (jax.ShapeDtypeStruct((M_pad, Cpad), jnp.bfloat16),) + p1_out_shape
        p1_out_specs = (pl.BlockSpec((TM, Cpad), lambda c, j: (c * n_half + j, 0)),) + p1_out_specs

    flops1 = 2 * M_pad * K * Cpad + 3 * M_pad * Cpad
    bytes1 = 2 * (M_pad * K + K * Cpad) + 4 * NC * 2 * Cpad + (2 * M_pad * Cpad if store_z else 0)
    p1 = pl.pallas_call(
        functools.partial(_conv_stats_kernel, store_z=store_z),
        out_shape=p1_out_shape,
        grid=(NC, n_half),
        in_specs=[
            pl.BlockSpec((TM, K), lambda c, j: (c * n_half + j, 0)),
            pl.BlockSpec((K, Cpad), lambda c, j: (0, 0)),
        ],
        out_specs=p1_out_specs,
        compiler_params=pltpu.CompilerParams(
            dimension_semantics=("parallel", "arbitrary")),
        cost_estimate=pl.CostEstimate(
            flops=flops1, transcendentals=0, bytes_accessed=bytes1),
    )(pat, w2d)
    if store_z:
        z2d, stats_parts = p1
    else:
        (stats_parts,) = p1

    # ---- BN scalar math, hoisted out of the kernels (tiny (Cpad,)-sized JAX ops) ----
    # Note: stats are on pre-bias z; mean_y = mean_z + b and var_y = var_z, so the conv
    # bias cancels: out = (z - mean_z) * gamma * inv_std + beta.
    stats = jnp.sum(stats_parts, axis=0)                    # combine per-core partials
    mean_z = stats[0] / M
    var = jnp.maximum(stats[1] / M - mean_z * mean_z, 0.0)  # biased variance (BN training)
    inv_std = jax.lax.rsqrt(var + EPS)
    scale_v = g_pad * inv_std
    shift_v = be_pad - mean_z * scale_v
    scale = scale_v.reshape(1, Cpad)
    shift = shift_v.reshape(1, Cpad)

    # ---- phase 2: affine + LeakyReLU, channel-major output (Cr rows only) ----
    out_T_shape = jax.ShapeDtypeStruct((Cr, M_pad), out_dtype)
    out_spec = pl.BlockSpec((Cr, TM), lambda i: (0, i))
    if store_z:
        flops2 = 4 * M_pad * Cpad
        bytes2 = 2 * M_pad * Cpad + 4 * (2 * Cpad + Cr * M_pad)
        out_T = pl.pallas_call(
            functools.partial(_stored_norm_kernel, c_rows=Cr),
            out_shape=out_T_shape,
            grid=(n_tiles,),
            in_specs=[
                pl.BlockSpec((TM, Cpad), lambda i: (i, 0)),
                pl.BlockSpec((1, Cpad), lambda i: (0, 0)),
                pl.BlockSpec((1, Cpad), lambda i: (0, 0)),
            ],
            out_specs=out_spec,
            compiler_params=pltpu.CompilerParams(dimension_semantics=("parallel",)),
            cost_estimate=pl.CostEstimate(
                flops=flops2, transcendentals=0, bytes_accessed=bytes2),
        )(z2d, scale, shift)
    else:
        flops2 = 2 * M_pad * K * Cpad + 4 * M_pad * Cpad
        bytes2 = 2 * (M_pad * K + K * Cpad) + 4 * (2 * Cpad + Cr * M_pad)
        out_T = pl.pallas_call(
            functools.partial(_recompute_norm_kernel, c_rows=Cr),
            out_shape=out_T_shape,
            grid=(n_tiles,),
            in_specs=[
                pl.BlockSpec((TM, K), lambda i: (i, 0)),
                pl.BlockSpec((K, Cpad), lambda i: (0, 0)),
                pl.BlockSpec((1, Cpad), lambda i: (0, 0)),
                pl.BlockSpec((1, Cpad), lambda i: (0, 0)),
            ],
            out_specs=out_spec,
            compiler_params=pltpu.CompilerParams(dimension_semantics=("parallel",)),
            cost_estimate=pl.CostEstimate(
                flops=flops2, transcendentals=0, bytes_accessed=bytes2),
        )(pat, w2d, scale, shift)

    # Channel-major -> NCHW: only the two small leading axes move; each copied chunk is a
    # contiguous Ho*Wo run (much cheaper than the old minor-dim relayout).
    out = out_T[:Cout, :M].reshape(Cout, N, Ho, Wo)
    return jnp.transpose(out, (1, 0, 2, 3))


# ---------------------------------------------------------------------------
# Reference + self-test
# ---------------------------------------------------------------------------
def _reference(x, weight, bias, gamma, beta):
    Cin = x.shape[1]
    Cout = weight.shape[0]
    stride = 1 if Cin == Cout else 2
    y = jax.lax.conv_general_dilated(
        x, weight, window_strides=(stride, stride),
        padding=((1, 1), (1, 1)),
        dimension_numbers=("NCHW", "OIHW", "NCHW"),
    ) + bias.reshape(1, -1, 1, 1)
    mean = y.mean(axis=(0, 2, 3), keepdims=True)
    var = ((y - mean) ** 2).mean(axis=(0, 2, 3), keepdims=True)  # biased (BN training)
    yh = (y - mean) * jax.lax.rsqrt(var + EPS) * gamma.reshape(1, -1, 1, 1) \
        + beta.reshape(1, -1, 1, 1)
    return jnp.where(yh >= 0, yh, NEG_SLOPE * yh)


def _run_case(key, N, Cin, Cout, H, W, tm):
    k_x, k_w, k_b, k_g, k_be = jax.random.split(key, 5)
    x = jax.random.normal(k_x, (N, Cin, H, W), dtype=jnp.float32)
    fan_in = Cin * 9
    bound = 1.0 / (fan_in ** 0.5)
    weight = jax.random.uniform(k_w, (Cout, Cin, 3, 3), jnp.float32, -bound, bound)
    bias = jax.random.uniform(k_b, (Cout,), jnp.float32, -bound, bound)
    gamma = jax.random.uniform(k_g, (Cout,), jnp.float32, 0.8, 1.2)
    beta = 0.1 * jax.random.normal(k_be, (Cout,), dtype=jnp.float32)

    out = batchnorm_block_forward(x, weight, bias, gamma, beta, tm=tm)
    out = jax.block_until_ready(out)

    ref = _reference(x, weight, bias, gamma, beta)
    assert out.shape == ref.shape, (out.shape, ref.shape)
    err = float(jnp.max(jnp.abs(out - ref)))
    # bf16 matmul inputs (and bf16 z spill on the large-K path) vs. an f32 reference.
    assert jnp.allclose(out, ref, atol=6e-2, rtol=6e-2), err
    assert float(jnp.mean(jnp.abs(out - ref))) < 2e-2, err


if __name__ == "__main__":
    key = jax.random.PRNGKey(0)
    k1, k2, k3, k4 = jax.random.split(key, 4)

    # 1) Cin != Cout -> stride-2 downsampling branch; single 128-row tile, Cout << 128.
    _run_case(k1, N=2, Cin=4, Cout=8, H=16, W=16, tm=1024)

    # 2) Cin == Cout -> stride 1; tm=128 gives 4 tiles: exercises the (2, 2) phase-1 grid
    #    (per-core stats partials) and sequential stats accumulation; M divides the tile.
    _run_case(k2, N=2, Cin=4, Cout=4, H=16, W=16, tm=128)

    # 3) Ragged M (144 rows): zero-padded tail tile feeding the (pre-bias) statistics.
    _run_case(k3, N=1, Cin=4, Cout=4, H=12, W=12, tm=128)

    # 4) Large K (9*Cin = 288 > 2*Cpad): exercises the bf16 z-spill path instead of the
    #    conv-recompute path, with the 2-core stats split.
    _run_case(k4, N=4, Cin=32, Cout=32, H=8, W=8, tm=128)

    print("KERNEL_OK")
</pallas_src>

<mosaic_0001>
module attributes {stable_mosaic.version = 11 : i64} {
  func.func @_conv_stats_kernel(%arg0: i32, %arg1: i32, %arg2: memref<128x36xbf16, #tpu.memory_space<vmem>>, %arg3: memref<36x128xbf16, #tpu.memory_space<vmem>>, %arg4: memref<1x2x128xf32, #tpu.memory_space<vmem>>) attributes {dimension_semantics = [#tpu.dimension_semantics<parallel>, #tpu.dimension_semantics<arbitrary>], iteration_bounds = array<i64: 1, 1>, scalar_prefetch = 0 : i64, scratch_operands = 0 : i64, tpu.core_type = #tpu.core_type<tc>, window_params = [{transform_indices = @transform_0, window_bounds = array<i64: 128, 36>}, {pipeline_mode = #tpu.pipeline_mode<synchronous>, transform_indices = @transform_1, window_bounds = array<i64: 36, 128>}, {transform_indices = @transform_2, window_bounds = array<i64: 1, 2, 128>}]} {
    %c0 = arith.constant 0 : index
    %c0_0 = arith.constant 0 : index
    %0 = vector.load %arg2[%c0, %c0_0] : memref<128x36xbf16, #tpu.memory_space<vmem>>, vector<128x36xbf16>
    %c0_1 = arith.constant 0 : index
    %c0_2 = arith.constant 0 : index
    %1 = vector.load %arg3[%c0_1, %c0_2] : memref<36x128xbf16, #tpu.memory_space<vmem>>, vector<36x128xbf16>
    %cst = arith.constant dense<0.000000e+00> : vector<128x128xf32>
    %2 = tpu.matmul %0, %1, %cst {dimension_numbers = #tpu.dot_dimension_numbers<[1], [0], [0], [1], [0, 0, 1, 1], [], []>} : vector<128x36xbf16>, vector<36x128xbf16>, vector<128x128xf32> -> vector<128x128xf32>
    %c0_i32 = arith.constant 0 : i32
    %3 = arith.cmpi eq, %arg1, %c0_i32 : i32
    %4 = arith.extui %3 : i1 to i32
    %c0_i32_3 = arith.constant 0 : i32
    %5 = arith.cmpi ne, %4, %c0_i32_3 : i32
    scf.if %5 {
      %cst_17 = arith.constant 0.000000e+00 : f32
      %23 = vector.broadcast %cst_17 : f32 to vector<2x128xf32>
      %c0_18 = arith.constant 0 : index
      %c0_19 = arith.constant 0 : index
      %c0_20 = arith.constant 0 : index
      %24 = vector.load %arg4[%c0_18, %c0_19, %c0_20] : memref<1x2x128xf32, #tpu.memory_space<vmem>>, vector<1x2x128xf32>
      %25 = vector.shape_cast %24 : vector<1x2x128xf32> to vector<2x128xf32>
      %26 = vector.shape_cast %23 : vector<2x128xf32> to vector<1x2x128xf32>
      tpu.vector_store %arg4[%c0_18, %c0_19, %c0_20], %26 {strides = array<i32>} : memref<1x2x128xf32, #tpu.memory_space<vmem>>, vector<1x2x128xf32>,
    } else {
    }
    %c0_4 = arith.constant 0 : index
    %c0_5 = arith.constant 0 : index
    %c0_6 = arith.constant 0 : index
    %6 = vector.load %arg4[%c0_4, %c0_5, %c0_6] : memref<1x2x128xf32, #tpu.memory_space<vmem>>, vector<1x1x128xf32>
    %7 = vector.shape_cast %6 : vector<1x1x128xf32> to vector<1x128xf32>
    %cst_7 = arith.constant dense<0.000000e+00> : vector<128xf32>
    %8 = vector.multi_reduction <add>, %2, %cst_7 [0] : vector<128x128xf32> to vector<128xf32>
    %9 = vector.shape_cast %8 : vector<128xf32> to vector<1x128xf32>
    %10 = arith.addf %7, %9 : vector<1x128xf32>
    %c0_8 = arith.constant 0 : index
    %c0_9 = arith.constant 0 : index
    %c0_10 = arith.constant 0 : index
    %11 = vector.load %arg4[%c0_8, %c0_9, %c0_10] : memref<1x2x128xf32, #tpu.memory_space<vmem>>, vector<1x1x128xf32>
    %12 = vector.shape_cast %11 : vector<1x1x128xf32> to vector<1x128xf32>
    %13 = vector.shape_cast %10 : vector<1x128xf32> to vector<1x1x128xf32>
    tpu.vector_store %arg4[%c0_8, %c0_9, %c0_10], %13 {strides = array<i32>} : memref<1x2x128xf32, #tpu.memory_space<vmem>>, vector<1x1x128xf32>,
    %c0_11 = arith.constant 0 : index
    %c1 = arith.constant 1 : index
    %c0_12 = arith.constant 0 : index
    %14 = vector.load %arg4[%c0_11, %c1, %c0_12] : memref<1x2x128xf32, #tpu.memory_space<vmem>>, vector<1x1x128xf32>
    %15 = vector.shape_cast %14 : vector<1x1x128xf32> to vector<1x128xf32>
    %16 = arith.mulf %2, %2 : vector<128x128xf32>
    %cst_13 = arith.constant dense<0.000000e+00> : vector<128xf32>
    %17 = vector.multi_reduction <add>, %16, %cst_13 [0] : vector<128x128xf32> to vector<128xf32>
    %18 = vector.shape_cast %17 : vector<128xf32> to vector<1x128xf32>
    %19 = arith.addf %15, %18 : vector<1x128xf32>
    %c0_14 = arith.constant 0 : index
    %c1_15 = arith.constant 1 : index
    %c0_16 = arith.constant 0 : index
    %20 = vector.load %arg4[%c0_14, %c1_15, %c0_16] : memref<1x2x128xf32, #tpu.memory_space<vmem>>, vector<1x1x128xf32>
    %21 = vector.shape_cast %20 : vector<1x1x128xf32> to vector<1x128xf32>
    %22 = vector.shape_cast %19 : vector<1x128xf32> to vector<1x1x128xf32>
    tpu.vector_store %arg4[%c0_14, %c1_15, %c0_16], %22 {strides = array<i32>} : memref<1x2x128xf32, #tpu.memory_space<vmem>>, vector<1x1x128xf32>,
    return
  }
  func.func @transform_0(%arg0: i32, %arg1: i32) -> (i32, i32) {
    %c1_i32 = arith.constant 1 : i32
    %0 = arith.muli %arg0, %c1_i32 : i32
    %1 = arith.addi %0, %arg1 : i32
    %c0_i32 = arith.constant 0 : i32
    %c0_i32_0 = arith.constant 0 : i32
    return %1, %c0_i32 : i32, i32
  }
  func.func @transform_1(%arg0: i32, %arg1: i32) -> (i32, i32) {
    %c0_i32 = arith.constant 0 : i32
    %c0_i32_0 = arith.constant 0 : i32
    %c0_i32_1 = arith.constant 0 : i32
    return %c0_i32, %c0_i32_0 : i32, i32
  }
  func.func @transform_2(%arg0: i32, %arg1: i32) -> (i32, i32, i32) {
    %c0_i32 = arith.constant 0 : i32
    %c0_i32_0 = arith.constant 0 : i32
    %c0_i32_1 = arith.constant 0 : i32
    return %arg0, %c0_i32, %c0_i32_0 : i32, i32, i32
  }
}

</mosaic_0001>

<bundles_post_ra>
// kernel: tpu_custom_call.1
= control target key start
LH: loop header
LB: loop body
LE: loop exit
PB: predicated region body
PF: predicated region fallthrough
CT: control target
= control target key end

     0   :  { %vm111_vm0 = vcmask 293888   ;;  %vm136_vm1 = vcmask 1041408   ;;  %s493_s0 = inlined_call_operand.vmem [shape: bf16[128,36], index: 0, kind: input, shape index: {}]   ;;  %s494_s1 = inlined_call_operand.vmem [shape: bf16[36,128], index: 1, kind: input, shape index: {}]   ;;  %s495_s2 = inlined_call_operand.hbm [shape: f32[1,2,128], index: 2, kind: output, shape index: {}]  }
   0x1   :  { %v388_v0 = vld [vmem:[%s494_s1] sm:$0xff]   ;;  %v389_v1 = vld [vmem:[%s494_s1 + $0x8] sm:$0xff]   ;;  %v390_v2 = vld [vmem:[%s494_s1 + $0x10] ss:$0 sps:$4 sm:$0x33]  }
   0x2   :  { %356 = vmatprep.subr.bf16.mxu0 %v388_v0  ;;  %v391_v3 = vld [vmem:[%s493_s0] sm:$0xff]   ;;  %378 = vmatprep.subr.bf16.mxu1 %v388_v0  ;;  %v138_v5 = vsel %vm136_vm1, %v390_v2, 0  ;;  %v392_v6 = vld [vmem:[%s493_s0 + $0x8] sm:$0xff]  }
   0x3   :  { %357 = vmatpush3.bf16.msra.mxu0 %v388_v0  ;;  %381 = vmatpush3.bf16.msra.mxu1 %v388_v0  ;;  %v395_v4 = vld [vmem:[%s493_s0 + $0x20] sm:$0xff]   ;;  %v396_v7 = vld [vmem:[%s493_s0 + $0x28] sm:$0xff]  }
   0x4   :  { %358 = vmatprep.subr.bf16.mxu0 %v389_v1  ;;  %362 = vmatprep.mubr.msk.bf16.mxu0 %vm111_vm0, %v391_v3 }
   0x5   :  { %379 = vmatprep.subr.bf16.mxu1 %v389_v1  ;;  %370 = vmatprep.mubr.msk.bf16.mxu1 %vm111_vm0, %v395_v4 }
   0x7   :  { %359 = vmatpush3.bf16.msra.mxu0 %v389_v1  ;;  %382 = vmatpush3.bf16.msra.mxu1 %v389_v1 }
   0x8   :  { %384 = vmatprep.subr.msk.bf16.mxu0 %vm136_vm1, %v390_v2  ;;  %385 = vmatprep.subr.msk.bf16.mxu1 %vm136_vm1, %v390_v2 }
   0x9   :  { %7 = vsyncpa [#allocation3], 0  ;;  %v393_v8 = vld [vmem:[%s493_s0 + $0x10] sm:$0xff]   ;;  %v394_v10 = vld [vmem:[%s493_s0 + $0x18] sm:$0xff]   ;;  %v423_v12 = vmov 0.0  }
   0xa   :  { %v397_v9 = vld [vmem:[%s493_s0 + $0x30] sm:$0xff]   ;;  %v398_v11 = vld [vmem:[%s493_s0 + $0x38] sm:$0xff]   ;;  %241 = vst [vmem:[#allocation2] sm:$0x3] %v423_v12  ;;  %s424_s0 = smov [#allocation2]  }
   0xb   :  { %361 = vmatpush3.bf16.msra.mxu0 %v138_v5  ;;  %383 = vmatpush3.bf16.msra.mxu1 %v138_v5  ;;  %s312_s30 = sshll.u32 %s424_s0, 4  ;;  %s313_s30 = int_to_ptr.vmem [resolvable:$true] %s312_s30 }
   0xc   :  { %s399_s3 = scalar_lea.vmem %s313_s30, 32  ;;  %p404_p1 = scmp.lt.s32.totalorder %s313_s30, %s313_s30 }
   0xd   :  { %p400_p0 = scmp.ne.s32.totalorder %s313_s30, %s399_s3  ;;  %p405_p2 = scmp.lt.s32.totalorder %s399_s3, %s399_s3 }
   0xe   :  { %363 = vmatmul.mubr.msk.bf16.vlgmr.msra.gmra.mrb[0].mxu0 %vm111_vm0, %v392_v6  ;;  %371 = vmatmul.mubr.msk.bf16.vlgmr.msra.gmra.mrb[0].mxu1 %vm111_vm0, %v396_v7 }
   0xf   :  { %366 = vmatprep.mubr.msk.bf16.mxu0 %vm111_vm0, %v393_v8  ;;  %374 = vmatprep.mubr.msk.bf16.mxu1 %vm111_vm0, %v397_v9  ;;  %p406_p3 = por %p405_p2, %p404_p1 }
  0x11   :  { %p407_p4 = pnand %p406_p3, %p400_p0 }
  0x16   :  { %367 = vmatmul.mubr.msk.bf16.gmra.mrb[4].mxu0 %vm111_vm0, %v394_v10  ;;  %375 = vmatmul.mubr.msk.bf16.gmra.mrb[4].mxu1 %vm111_vm0, %v398_v11 }
  0xe1   :  { %v364_v13 = vpop.f32.mrb[0].mxu0  ;;  %v372_v14 = vpop.f32.mrb[0].mxu1 }
  0xe2   :  { %v174_v15 = vpop.f32.mrb[1].mxu0  ;;  %v206_v16 = vpop.f32.mrb[1].mxu1  ;;  %v269_v24 = vmul.f32 %v364_v13, %v364_v13  ;;  %v277_v56 = vmul.f32 %v372_v14, %v372_v14 }
  0xe3   :  { %v365_v17 = vpop.f32.mrb[2].mxu0  ;;  %v373_v18 = vpop.f32.mrb[2].mxu1  ;;  %v267_v21 = vmul.f32 %v174_v15, %v174_v15  ;;  %v275_v50 = vmul.f32 %v206_v16, %v206_v16 }
  0xe4   :  { %v177_v19 = vpop.f32.mrb[3].mxu0  ;;  %v209_v20 = vpop.f32.mrb[3].mxu1  ;;  %v270_v27 = vmul.f32 %v365_v17, %v365_v17  ;;  %v278_v59 = vmul.f32 %v373_v18, %v373_v18 }
  0xe5   :  { %v243_v22 = vadd.f32 %v177_v19, %v174_v15  ;;  %v268_v23 = vmul.f32 %v177_v19, %v177_v19  ;;  %v276_v55 = vmul.f32 %v209_v20, %v209_v20 }
  0xe7   :  { %v244_v25 = vadd.f32 %v364_v13, %v243_v22  ;;  %v283_v26 = vadd.f32 %v268_v23, %v267_v21  ;;  %v266_v23 = vld [vmem:[#allocation2 + $0x1] sm:$0x1] }
  0xe9   :  { %v284_v28 = vadd.f32 %v283_v26, %v269_v24  ;;  %v368_v29 = vpop.f32.mrb[4].mxu0  ;;  %v245_v30 = vadd.f32 %v365_v17, %v244_v25  ;;  %v376_v31 = vpop.f32.mrb[4].mxu1 }
  0xea   :  { %v190_v32 = vpop.f32.mrb[5].mxu0  ;;  %v222_v33 = vpop.f32.mrb[5].mxu1  ;;  %v273_v44 = vmul.f32 %v368_v29, %v368_v29  ;;  %v281_v4 = vmul.f32 %v376_v31, %v376_v31 }
  0xeb   :  { %v246_v34 = vadd.f32 %v245_v30, %v190_v32  ;;  %v271_v35 = vmul.f32 %v190_v32, %v190_v32  ;;  %v285_v36 = vadd.f32 %v284_v28, %v270_v27  ;;  %v369_v37 = vpop.f32.mrb[6].mxu0  ;;  %v377_v38 = vpop.f32.mrb[6].mxu1  ;;  %v279_v62 = vmul.f32 %v222_v33, %v222_v33 }
  0xec   :  { %v193_v39 = vpop.f32.mrb[7].mxu0  ;;  %v225_v40 = vpop.f32.mrb[7].mxu1  ;;  %v274_v47 = vmul.f32 %v369_v37, %v369_v37  ;;  %v282_v7 = vmul.f32 %v377_v38, %v377_v38 }
  0xed   :  { %v286_v41 = vadd.f32 %v285_v36, %v271_v35  ;;  %v247_v42 = vadd.f32 %v246_v34, %v193_v39  ;;  %v272_v43 = vmul.f32 %v193_v39, %v193_v39  ;;  %v280_v3 = vmul.f32 %v225_v40, %v225_v40 }
  0xef   :  { %v248_v45 = vadd.f32 %v368_v29, %v247_v42  ;;  %v287_v46 = vadd.f32 %v286_v41, %v272_v43 }
  0xf1   :  { %v288_v48 = vadd.f32 %v287_v46, %v273_v44  ;;  %v249_v49 = vadd.f32 %v369_v37, %v248_v45 }
  0xf3   :  { %v250_v51 = vadd.f32 %v249_v49, %v206_v16  ;;  %v289_v52 = vadd.f32 %v288_v48, %v274_v47 }
  0xf5   :  { %v290_v53 = vadd.f32 %v289_v52, %v275_v50  ;;  %v251_v54 = vadd.f32 %v250_v51, %v209_v20  ;;  %v242_v20 = vld [vmem:[#allocation2] sm:$0x1] }
  0xf7   :  { %v252_v57 = vadd.f32 %v372_v14, %v251_v54  ;;  %v291_v58 = vadd.f32 %v290_v53, %v276_v55 }
  0xf9   :  { %v292_v60 = vadd.f32 %v291_v58, %v277_v56  ;;  %v253_v61 = vadd.f32 %v373_v18, %v252_v57 }
  0xfb   :  { %v254_v63 = vadd.f32 %v253_v61, %v222_v33  ;;  %v293_v0 = vadd.f32 %v292_v60, %v278_v59 }
  0xfd   :  { %v294_v1 = vadd.f32 %v293_v0, %v279_v62  ;;  %v255_v2 = vadd.f32 %v254_v63, %v225_v40 }
  0xff   :  { %v256_v5 = vadd.f32 %v376_v31, %v255_v2  ;;  %v295_v6 = vadd.f32 %v294_v1, %v280_v3 }
 0x101   :  { %v257_v8 = vadd.f32 %v377_v38, %v256_v5  ;;  %v296_v9 = vadd.f32 %v295_v6, %v281_v4 }
 0x103   :  { %v258_v10 = vrot.slane %v257_v8, 4  ;;  %v297_v11 = vadd.f32 %v296_v9, %v282_v7 }
 0x105   :  { %v259_v12 = vadd.f32 %v258_v10, %v257_v8  ;;  %v298_v13 = vrot.slane %v297_v11, 4 }
 0x107   :  { %v260_v14 = vrot.slane %v259_v12, 2  ;;  %v299_v15 = vadd.f32 %v298_v13, %v297_v11 }
 0x109   :  { %v261_v16 = vadd.f32 %v260_v14, %v259_v12  ;;  %v300_v17 = vrot.slane %v299_v15, 2 }
 0x10b   :  { %v262_v18 = vrot.slane %v261_v16, 1  ;;  %v301_v19 = vadd.f32 %v300_v17, %v299_v15 }
 0x10d   :  { %v263_v21 = vadd.f32 %v262_v18, %v261_v16  ;;  %v302_v22 = vrot.slane %v301_v19, 1 }
 0x10f   :  { %v264_v24 = vadd.f32 %v263_v21, %v242_v20  ;;  %v303_v25 = vadd.f32 %v302_v22, %v301_v19 }
 0x111   :  { %265 = vst [vmem:[#allocation2] sm:$0x1] %v264_v24  ;;  %v304_v26 = vadd.f32 %v303_v25, %v266_v23 }
 0x113   :  { %305 = vst [vmem:[#allocation2 + $0x1] sm:$0x1] %v304_v26 }
 0x114   :  { %410 = shalt.err (!%p407_p4)
}
 0x115   :  { %s411_s6 = scalar_lea.hbm %s495_s2, 32 }
 0x116   :  { %p412_p5 = scmp.ne.s32.totalorder %s495_s2, %s411_s6  ;;  %p415_p6 = scmp.lt.u32.totalorder %s411_s6, %s495_s2 }
 0x118   :  { %p417_p7 = pnand %p415_p6, %p412_p5 }
 0x11a   :  { %420 = shalt.err (!%p417_p7)
}
 0x11b   :  { %315 = dma.vmem_to_hbm [thread:$0]  %s313_s30, 32, %s495_s2, [#allocation3]  }
 0x11c   :  { %421 = dma.done.wait [#allocation3], 32  }
 0x11d   :  { %422 = vsyncadd [#allocation3], 4294967264 }
 0x11e   :  { %319 = vsyncpa [#allocation3], 1 }

</bundles_post_ra>
